<compile_context>
chip_gen: v5e
topology: v5e:2x2
jax: 0.10.0
libtpu: 0.0.40
codegen_flags: <defaults>
</compile_context>

<pallas_src>
import functools
import math

import jax
import jax.numpy as jnp
from jax import lax
from jax.experimental import pallas as pl
from jax.experimental.pallas import tpu as pltpu


def _round_up(v, m):
    return ((v + m - 1) // m) * m


def _head_kernel(x_ref, wT_ref, b_ref, out_ref, *, n_components):
    C = n_components
    # Linear: [tm, D] @ [D, OD_pad] + [1, OD_pad]   (MXU matmul, f32 accumulate)
    out = jnp.dot(x_ref[...], wT_ref[...],
                  preferred_element_type=jnp.float32) + b_ref[...]

    # Lane index for every column of the fused output slab.
    col = lax.broadcasted_iota(jnp.int32, out.shape, dimension=1)

    # log_softmax restricted to the mixture-weight columns [4C, 5C).
    w_mask = jnp.logical_and(col >= 4 * C, col < 5 * C)
    w_masked = jnp.where(w_mask, out, -jnp.inf)
    w_max = jnp.max(w_masked, axis=-1, keepdims=True)
    p = jnp.where(w_mask, jnp.exp(out - w_max), 0.0)
    lse = jnp.log(jnp.sum(p, axis=-1, keepdims=True)) + w_max
    log_softmax = out - lse

    # Full-width elementwise transforms (only the selected lanes are kept).
    exp_out = jnp.exp(out)                              # stdevs = exp(std_raw)
    corr = jnp.clip(jnp.tanh(out), -0.999, 0.999)       # correlations

    fused = jnp.where(
        col < 2 * C, out,                               # means: raw
        jnp.where(col < 4 * C, exp_out,                 # stdevs
                  jnp.where(col < 5 * C, log_softmax,   # log_weights
                            jnp.where(col < 6 * C, corr,  # correlations
                                      out))))           # last logit + zero pad

    out_ref[...] = fused                                # single lane-dense store


def _choose_tm(M, D, od_pad, *, budget_bytes=36 * 1024 * 1024, tm_max=512):
    """Pick the largest row tile that keeps double-buffered tiles in budget."""
    wT_bytes = 2 * D * od_pad * 4                  # weight (double-buffered)
    row_bytes = 2 * 4 * (D + od_pad)               # x tile + fused output tile
    avail = budget_bytes - wT_bytes
    by_budget = avail // row_bytes if avail > row_bytes else 8
    tm = min(tm_max, by_budget, _round_up(M, 8))
    tm = max(8, (tm // 8) * 8)                     # sublane-aligned
    return tm


def bivariate_bernoulli_mixture_head(x, weight, bias, n_components, *, tm=None):
    """Forward pass of BivariateBernoulliMixtureHead.

    Args:
      x:       [B, T, D]  float32
      weight:  [6*C+1, D] float32   (PyTorch nn.Linear weight layout)
      bias:    [6*C+1]    float32
      n_components: C

    Returns:
      means        [B, T, C, 2]
      stdevs       [B, T, C, 2]
      log_weights  [B, T, C]
      correlations [B, T, C]
      last_prob    [B, T]   (raw Bernoulli logit, as in the PyTorch module)
    """
    B, T, D = x.shape
    C = n_components
    OD = 6 * C + 1
    OD_pad = max(128, _round_up(OD, 128))
    assert weight.shape == (OD, D) and bias.shape == (OD,)

    M = B * T
    if tm is None:
        tm = _choose_tm(M, D, OD_pad)
    M_pad = _round_up(M, tm)

    x2d = x.reshape(M, D).astype(jnp.float32)
    if M_pad != M:
        x2d = jnp.pad(x2d, ((0, M_pad - M), (0, 0)))

    # Lane-dense padded weight / bias: zero columns beyond the real OD.
    wT = jnp.zeros((D, OD_pad), jnp.float32).at[:, :OD].set(
        weight.T.astype(jnp.float32))
    b2d = jnp.zeros((1, OD_pad), jnp.float32).at[:, :OD].set(
        bias.astype(jnp.float32))

    grid = (M_pad // tm,)

    fused = pl.pallas_call(
        functools.partial(_head_kernel, n_components=C),
        out_shape=jax.ShapeDtypeStruct((M_pad, OD_pad), jnp.float32),
        grid=grid,
        in_specs=[
            pl.BlockSpec((tm, D), lambda i: (i, 0)),       # x row tile
            pl.BlockSpec((D, OD_pad), lambda i: (0, 0)),   # padded weight
            pl.BlockSpec((1, OD_pad), lambda i: (0, 0)),   # padded bias
        ],
        out_specs=pl.BlockSpec((tm, OD_pad), lambda i: (i, 0)),
        compiler_params=pltpu.CompilerParams(
            dimension_semantics=("parallel",),
            vmem_limit_bytes=48 * 1024 * 1024),
    )(x2d, wT, b2d)

    fused = fused[:M]
    means = fused[:, : 2 * C].reshape(B, T, C, 2)
    stdevs = fused[:, 2 * C: 4 * C].reshape(B, T, C, 2)
    log_weights = fused[:, 4 * C: 5 * C].reshape(B, T, C)
    correlations = fused[:, 5 * C: 6 * C].reshape(B, T, C)
    last_prob = fused[:, 6 * C].reshape(B, T)
    return means, stdevs, log_weights, correlations, last_prob


def _reference(x, weight, bias, n_components):
    """Pure-JAX reference mirroring the PyTorch forward."""
    C = n_components
    out = jnp.einsum("btd,od->bto", x, weight) + bias
    mixture, last_prob = out[..., :-1], out[..., -1]
    means = mixture[..., : 2 * C].reshape(*out.shape[:-1], C, 2)
    stdevs = jnp.exp(mixture[..., 2 * C: 4 * C]).reshape(*out.shape[:-1], C, 2)
    w_raw = mixture[..., 4 * C: 5 * C]
    log_weights = jax.nn.log_softmax(w_raw, axis=-1)
    correlations = jnp.clip(jnp.tanh(mixture[..., 5 * C: 6 * C]), -0.999, 0.999)
    return means, stdevs, log_weights, correlations, last_prob


if __name__ == "__main__":
    B, T, D, C = 2, 8, 32, 4
    OD = 6 * C + 1

    key = jax.random.PRNGKey(0)
    kx, kw, kb = jax.random.split(key, 3)

    x = jax.random.normal(kx, (B, T, D), dtype=jnp.float32)
    # Deterministic init mimicking nn.Linear: U(-1/sqrt(D), 1/sqrt(D))
    bound = 1.0 / math.sqrt(D)
    weight = jax.random.uniform(kw, (OD, D), jnp.float32, -bound, bound)
    bias = jax.random.uniform(kb, (OD,), jnp.float32, -bound, bound)

    outs = bivariate_bernoulli_mixture_head(x, weight, bias, C)
    outs = jax.block_until_ready(outs)

    refs = _reference(x, weight, bias, C)
    for o, r in zip(outs, refs):
        assert o.shape == r.shape, (o.shape, r.shape)
        assert jnp.allclose(o, r, atol=1e-5, rtol=1e-5), "mismatch vs reference"

    print("KERNEL_OK")
</pallas_src>

<mosaic_0001>
module attributes {stable_mosaic.version = 11 : i64} {
  func.func @_head_kernel(%arg0: i32, %arg1: memref<16x32xf32, #tpu.memory_space<vmem>>, %arg2: memref<32x128xf32, #tpu.memory_space<vmem>>, %arg3: memref<1x128xf32, #tpu.memory_space<vmem>>, %arg4: memref<16x128xf32, #tpu.memory_space<vmem>>) attributes {dimension_semantics = [#tpu.dimension_semantics<parallel>], iteration_bounds = array<i64: 1>, scalar_prefetch = 0 : i64, scratch_operands = 0 : i64, tpu.core_type = #tpu.core_type<tc>, window_params = [{transform_indices = @transform_0, window_bounds = array<i64: 16, 32>}, {pipeline_mode = #tpu.pipeline_mode<synchronous>, transform_indices = @transform_1, window_bounds = array<i64: 32, 128>}, {pipeline_mode = #tpu.pipeline_mode<synchronous>, transform_indices = @transform_2, window_bounds = array<i64: 1, 128>}, {transform_indices = @transform_3, window_bounds = array<i64: 16, 128>}]} {
    %c0 = arith.constant 0 : index
    %c0_0 = arith.constant 0 : index
    %0 = vector.load %arg1[%c0, %c0_0] : memref<16x32xf32, #tpu.memory_space<vmem>>, vector<16x32xf32>
    %c0_1 = arith.constant 0 : index
    %c0_2 = arith.constant 0 : index
    %1 = vector.load %arg2[%c0_1, %c0_2] : memref<32x128xf32, #tpu.memory_space<vmem>>, vector<32x128xf32>
    %cst = arith.constant dense<0.000000e+00> : vector<16x128xf32>
    %2 = tpu.matmul %0, %1, %cst {dimension_numbers = #tpu.dot_dimension_numbers<[1], [0], [0], [1], [0, 0, 1, 1], [], []>} : vector<16x32xf32>, vector<32x128xf32>, vector<16x128xf32> -> vector<16x128xf32>
    %c0_3 = arith.constant 0 : index
    %c0_4 = arith.constant 0 : index
    %3 = vector.load %arg3[%c0_3, %c0_4] : memref<1x128xf32, #tpu.memory_space<vmem>>, vector<1x128xf32>
    %4 = vector.broadcast %3 : vector<1x128xf32> to vector<16x128xf32>
    %5 = arith.addf %2, %4 : vector<16x128xf32>
    %6 = tpu.iota {dimensions = array<i32: 1>} : vector<16x128xi32>
    %c16_i32 = arith.constant 16 : i32
    %7 = vector.broadcast %c16_i32 : i32 to vector<16x128xi32>
    %8 = arith.cmpi sge, %6, %7 : vector<16x128xi32>
    %c20_i32 = arith.constant 20 : i32
    %9 = vector.broadcast %c20_i32 : i32 to vector<16x128xi32>
    %10 = arith.cmpi slt, %6, %9 : vector<16x128xi32>
    %11 = arith.andi %8, %10 : vector<16x128xi1>
    %cst_5 = arith.constant 0xFF800000 : f32
    %12 = vector.broadcast %cst_5 : f32 to vector<16x128xf32>
    %13 = arith.select %11, %5, %12 : vector<16x128xi1>, vector<16x128xf32>
    %cst_6 = arith.constant dense<0xFF800000> : vector<16xf32>
    %14 = vector.multi_reduction <maximumf>, %13, %cst_6 [1] : vector<16x128xf32> to vector<16xf32>
    %15 = vector.shape_cast %14 : vector<16xf32> to vector<16x1xf32>
    %16 = vector.broadcast %15 : vector<16x1xf32> to vector<16x128xf32>
    %17 = arith.subf %5, %16 : vector<16x128xf32>
    %18 = math.exp %17 : vector<16x128xf32>
    %cst_7 = arith.constant 0.000000e+00 : f32
    %19 = vector.broadcast %cst_7 : f32 to vector<16x128xf32>
    %20 = arith.select %11, %18, %19 : vector<16x128xi1>, vector<16x128xf32>
    %cst_8 = arith.constant dense<0.000000e+00> : vector<16xf32>
    %21 = vector.multi_reduction <add>, %20, %cst_8 [1] : vector<16x128xf32> to vector<16xf32>
    %22 = vector.shape_cast %21 : vector<16xf32> to vector<16x1xf32>
    %23 = math.log %22 : vector<16x1xf32>
    %24 = arith.addf %23, %15 : vector<16x1xf32>
    %25 = vector.broadcast %24 : vector<16x1xf32> to vector<16x128xf32>
    %26 = arith.subf %5, %25 : vector<16x128xf32>
    %27 = math.exp %5 : vector<16x128xf32>
    %28 = math.tanh %5 : vector<16x128xf32>
    %cst_9 = arith.constant -9.990000e-01 : f32
    %cst_10 = arith.constant 9.990000e-01 : f32
    %29 = vector.broadcast %cst_9 : f32 to vector<16x128xf32>
    %30 = arith.maximumf %29, %28 : vector<16x128xf32>
    %31 = vector.broadcast %cst_10 : f32 to vector<16x128xf32>
    %32 = arith.minimumf %31, %30 : vector<16x128xf32>
    %c8_i32 = arith.constant 8 : i32
    %33 = vector.broadcast %c8_i32 : i32 to vector<16x128xi32>
    %34 = arith.cmpi slt, %6, %33 : vector<16x128xi32>
    %c16_i32_11 = arith.constant 16 : i32
    %35 = vector.broadcast %c16_i32_11 : i32 to vector<16x128xi32>
    %36 = arith.cmpi slt, %6, %35 : vector<16x128xi32>
    %c20_i32_12 = arith.constant 20 : i32
    %37 = vector.broadcast %c20_i32_12 : i32 to vector<16x128xi32>
    %38 = arith.cmpi slt, %6, %37 : vector<16x128xi32>
    %c24_i32 = arith.constant 24 : i32
    %39 = vector.broadcast %c24_i32 : i32 to vector<16x128xi32>
    %40 = arith.cmpi slt, %6, %39 : vector<16x128xi32>
    %41 = arith.select %40, %32, %5 : vector<16x128xi1>, vector<16x128xf32>
    %42 = arith.select %38, %26, %41 : vector<16x128xi1>, vector<16x128xf32>
    %43 = arith.select %36, %27, %42 : vector<16x128xi1>, vector<16x128xf32>
    %44 = arith.select %34, %5, %43 : vector<16x128xi1>, vector<16x128xf32>
    %c0_13 = arith.constant 0 : index
    %c0_14 = arith.constant 0 : index
    %45 = vector.load %arg4[%c0_13, %c0_14] : memref<16x128xf32, #tpu.memory_space<vmem>>, vector<16x128xf32>
    tpu.vector_store %arg4[%c0_13, %c0_14], %44 {strides = array<i32>} : memref<16x128xf32, #tpu.memory_space<vmem>>, vector<16x128xf32>,
    return
  }
  func.func @transform_0(%arg0: i32) -> (i32, i32) {
    %c0_i32 = arith.constant 0 : i32
    %c0_i32_0 = arith.constant 0 : i32
    return %arg0, %c0_i32 : i32, i32
  }
  func.func @transform_1(%arg0: i32) -> (i32, i32) {
    %c0_i32 = arith.constant 0 : i32
    %c0_i32_0 = arith.constant 0 : i32
    %c0_i32_1 = arith.constant 0 : i32
    return %c0_i32, %c0_i32_0 : i32, i32
  }
  func.func @transform_2(%arg0: i32) -> (i32, i32) {
    %c0_i32 = arith.constant 0 : i32
    %c0_i32_0 = arith.constant 0 : i32
    %c0_i32_1 = arith.constant 0 : i32
    return %c0_i32, %c0_i32_0 : i32, i32
  }
  func.func @transform_3(%arg0: i32) -> (i32, i32) {
    %c0_i32 = arith.constant 0 : i32
    %c0_i32_0 = arith.constant 0 : i32
    return %arg0, %c0_i32 : i32, i32
  }
}

</mosaic_0001>

<bundles_post_ra>
// kernel: tpu_custom_call.1
= control target key start
LH: loop header
LB: loop body
LE: loop exit
PB: predicated region body
PF: predicated region fallthrough
CT: control target
= control target key end

     0   :  { %8 = vsyncpa [#allocation3], 0  ;;  %s352_s0 = inlined_call_operand.hbm [shape: f32[16,32], index: 0, kind: input, shape index: {}]   ;;  %s353_s1 = inlined_call_operand.hbm [shape: f32[32,128], index: 1, kind: input, shape index: {}]   ;;  %s354_s2 = inlined_call_operand.vmem [shape: f32[1,128], index: 2, kind: input, shape index: {}]   ;;  %s355_s3 = inlined_call_operand.hbm [shape: f32[16,128], index: 3, kind: output, shape index: {}]  }
   0x1   :  { %9 = vsyncpa [#allocation6], 0 }
   0x2   :  { %10 = vsyncpa [#allocation4], 0  ;;  %s15_s14 = sshll.u32 %s352_s0, 4  ;;  %s269_s15 = smov [#allocation2]   ;;  %s16_s14 = int_to_ptr.hbm [resolvable:$true] %s15_s14 }
   0x3   :  { %s17_s16 = sshll.u32 %s269_s15, 4  ;;  %s28_s19 = sshll.u32 %s353_s1, 4  ;;  %s18_s16 = int_to_ptr.vmem [resolvable:$true] %s17_s16  ;;  %s29_s19 = int_to_ptr.hbm [resolvable:$true] %s28_s19 }
   0x4   :  { %s270_s20 = smov 128   ;;  %s271_s21 = smov 8  }
   0x5   :  { %23 = dma.hbm_to_vmem [thread:$0]  %s16_s14, 256, %s18_s16, [#allocation3], %s270_s20, %s270_s20, %s271_s21  }
   0x6   :  { %s272_s22 = smov [#allocation5]  }
   0x7   :  { %s30_s23 = sshll.u32 %s272_s22, 4  ;;  %s31_s23 = int_to_ptr.vmem [resolvable:$true] %s30_s23 }
   0x8   :  { %36 = dma.hbm_to_vmem [thread:$0]  %s29_s19, 512, %s31_s23, [#allocation6], %s270_s20, %s270_s20, %s271_s21  }
   0x9   :  { %263 = dma.done.wait [#allocation3], 256  }
   0xa   :  { %264 = vsyncadd [#allocation3], 4294967040 }
   0xb   :  { %265 = dma.done.wait [#allocation6], 512  }
   0xc   :  { %266 = vsyncadd [#allocation6], 4294966784  ;;  %v52_v0 = vld [vmem:[#allocation5 + $0x18] sm:$0xff]  ;;  %v51_v1 = vld [vmem:[#allocation5 + $0x10] sm:$0xff]  ;;  %vm57_vm0 = vcmask 261120   ;;  %v87_v6 = vlaneseq  ;;  %s147_s27 = sshll.u32 %s355_s3, 4  ;;  %s148_s27 = int_to_ptr.hbm [resolvable:$true] %s147_s27 }
   0xd   :  { %76 = vmatpush.msra.mxu0 %v52_v0  ;;  %165 = vmatpush.msra.mxu1 %v52_v0  ;;  %v50_v2 = vld [vmem:[#allocation5 + $0x8] sm:$0xff]  ;;  %v49_v3 = vld [vmem:[#allocation5] sm:$0xff]  ;;  %v47_v4 = vld [vmem:[#allocation2] sm:$0xff] }
   0xe   :  { %v48_v5 = vld [vmem:[#allocation2 + $0x8] sm:$0xff]  ;;  %v306_v7 = vand.u32 127, %v87_v6  ;;  %v174_v8 = vld [vmem:[%s354_s2] ss:$0 sm:$0xff]  ;;  %s273_s2 = smov [#allocation7]  }
   0xf   :  { %77 = vmatpush.msra.mxu0 %v51_v1  ;;  %166 = vmatpush.msra.mxu1 %v51_v1  ;;  %s145_s24 = sshll.u32 %s273_s2, 4  ;;  %s146_s24 = int_to_ptr.vmem [resolvable:$true] %s145_s24 }
  0x10   :  { %vm89_vm1 = vcmp.ge.s32.totalorder %v306_v7, 16  ;;  %vm90_vm2 = vcmp.lt.s32.totalorder %v306_v7, 20  ;;  %vm130_vm4 = vcmp.lt.s32.totalorder %v306_v7, 24  ;;  %vm129_vm5 = vcmp.lt.s32.totalorder %v306_v7, 16 }
  0x11   :  { %78 = vmatpush.msra.mxu0 %v50_v2  ;;  %167 = vmatpush.msra.mxu1 %v50_v2  ;;  %vm315_vm3 = vmand %vm89_vm1, %vm90_vm2  ;;  %vm128_vm6 = vcmp.lt.s32.totalorder %v306_v7, 8 }
  0x13   :  { %79 = vmatpush.msra.mxu0 %v49_v3  ;;  %168 = vmatpush.msra.mxu1 %v49_v3 }
  0x14   :  { %161 = vmatmul.msk.f32.vlgmr.msra.gmra.mxu0 %vm57_vm0, %v47_v4  ;;  %162 = vmatmul.msk.f32.vlgmr.msra.gmra.mxu1 %vm57_vm0, %v48_v5 }
  0x91   :  { %v81_v9 = vpop.f32.mrf.mxu0  ;;  %v84_v13 = vpop.f32.mrf.mxu1 }
  0x92   :  { %v82_v11 = vadd.f32 %v174_v8, %v81_v9  ;;  %v85_v14 = vadd.f32 %v174_v8, %v84_v13 }
  0x94   :  { %v92_v12 = vsel %vm315_vm3, %v82_v11, -inf  ;;  %v93_v15 = vsel %vm315_vm3, %v85_v14, -inf  ;;  %v118_v27 = vmul.f32 1.442695, %v82_v11  ;;  %v120_v34 = vmul.f32 1.442695, %v85_v14 }
  0x95   :  { %94 = vmax.xlane.f32.xlu0 %v92_v12 }
  0x9d   :  { %96 = vmax.xlane.f32.xlu0 %v93_v15 }
 0x108   :  { %v95_v16 = vpop.xlane.xlu0 %94 }
 0x109   :  { %v98_v17 = vsub.f32 %v82_v11, %v95_v16 }
 0x10b   :  { %v100_v18 = vmul.f32 1.442695, %v98_v17 }
 0x10d   :  { %175 = vpow2.f32 %v100_v18 }
 0x110   :  { %v97_v19 = vpop.xlane.xlu0 %96 }
 0x111   :  { %v99_v20 = vsub.f32 %v85_v14, %v97_v19 }
 0x113   :  { %v176_v21 = vpop.eup %175  ;;  %v102_v22 = vmul.f32 1.442695, %v99_v20 }
 0x114   :  { %v104_v23 = vsel %vm315_vm3, %v176_v21, 0.0 }
 0x115   :  { %177 = vpow2.f32 %v102_v22  ;;  %106 = vadd.xlane.f32.xlu1 %v104_v23 }
 0x116   :  { %179 = vtanh.f32 %v82_v11 }
 0x11b   :  { %v178_v24 = vpop.eup %177 }
 0x11c   :  { %v105_v25 = vsel %vm315_vm3, %v178_v24, 0.0  ;;  %v180_v28 = vpop.eup %179 }
 0x11d   :  { %108 = vadd.xlane.f32.xlu1 %v105_v25  ;;  %v163_v32 = vclamps-f32 %v180_v28, 0.999 }
 0x11f   :  { %v131_v37 = vsel %vm130_vm4, %v163_v32, %v82_v11 }
 0x188   :  { %v107_v26 = vpop.xlane.xlu1 %106 }
 0x189   :  { %181 = vlog2.f32 %v107_v26 }
 0x18a   :  { %183 = vtanh.f32 %v85_v14 }
 0x18b   :  { %185 = vpow2.f32 %v118_v27 }
 0x18f   :  { %v182_v29 = vpop.eup %181 }
 0x190   :  { %v111_v30 = vmul.f32 0.6931472, %v182_v29  ;;  %v109_v31 = vpop.xlane.xlu1 %108  ;;  %v184_v36 = vpop.eup %183 }
 0x191   :  { %187 = vlog2.f32 %v109_v31  ;;  %v186_v38 = vpop.eup %185  ;;  %v164_v44 = vclamps-f32 %v184_v36, 0.999 }
 0x192   :  { %v114_v33 = vadd.f32 %v111_v30, %v95_v16  ;;  %189 = vpow2.f32 %v120_v34 }
 0x193   :  { %v132_v47 = vsel %vm130_vm4, %v164_v44, %v85_v14 }
 0x194   :  { %v116_v35 = vsub.f32 %v82_v11, %v114_v33 }
 0x196   :  { %v133_v39 = vsel %vm90_vm2, %v116_v35, %v131_v37 }
 0x197   :  { %v188_v40 = vpop.eup %187  ;;  %v135_v41 = vsel %vm129_vm5, %v186_v38, %v133_v39 }
 0x198   :  { %v113_v42 = vmul.f32 0.6931472, %v188_v40  ;;  %v137_v43 = vsel %vm128_vm6, %v82_v11, %v135_v41  ;;  %v190_v48 = vpop.eup %189 }
 0x199   :  { %139 = vst [vmem:[#allocation7] sm:$0xff] %v137_v43 }
 0x19a   :  { %v115_v45 = vadd.f32 %v113_v42, %v97_v19 }
 0x19c   :  { %v117_v46 = vsub.f32 %v85_v14, %v115_v45 }
 0x19e   :  { %v134_v49 = vsel %vm90_vm2, %v117_v46, %v132_v47 }
 0x19f   :  { %v136_v50 = vsel %vm129_vm5, %v190_v48, %v134_v49 }
 0x1a0   :  { %v138_v51 = vsel %vm128_vm6, %v85_v14, %v136_v50 }
 0x1a1   :  { %140 = vst [vmem:[#allocation7 + $0x8] sm:$0xff] %v138_v51 }
 0x1a2   :  { %153 = dma.vmem_to_hbm [thread:$0]  %s146_s24, 256, %s148_s27, [#allocation4], %s270_s20, %s270_s20, %s271_s21  }
 0x1a3   :  { %267 = dma.done.wait [#allocation4], 256  }
 0x1a4   :  { %268 = vsyncadd [#allocation4], 4294967040 }
 0x1a5   :  { %158 = vsyncpa [#allocation3], 1 }
 0x1a6   :  { %159 = vsyncpa [#allocation6], 1 }
 0x1a7   :  { %160 = vsyncpa [#allocation4], 1 }

</bundles_post_ra>
